<compile_context>
chip_gen: v7x
topology: tpu7x:2x2x1
jax: 0.10.0
libtpu: 0.0.40
codegen_flags: <defaults>
</compile_context>

<pallas_src>
import functools

import jax
import jax.numpy as jnp
from jax import lax
from jax.experimental import pallas as pl
from jax.experimental.pallas import tpu as pltpu

LANES = 128
MAX_BLOCK_ROWS = 2048  # 2048x128 f32 = 1 MiB per block (2 MiB double-buffered)


def _round_up(x, m):
    return ((x + m - 1) // m) * m


def _bce_loss(y, target, with_logits):
    """Elementwise BCE in f32, specialized on the compile-time Python float `target`."""
    if with_logits:
        # Numerically stable BCE-with-logits: max(y,0) - y*t + log1p(exp(-|y|))
        softplus_tail = jnp.log1p(jnp.exp(-jnp.abs(y)))
        if target == 1.0:
            return jnp.maximum(-y, 0.0) + softplus_tail
        if target == 0.0:
            return jnp.maximum(y, 0.0) + softplus_tail
        return jnp.maximum(y, 0.0) - y * jnp.float32(target) + softplus_tail
    # Plain BCE on probabilities (PyTorch clamps each log term at -100).
    log_y = jnp.maximum(jnp.log(y), -100.0)
    log_1my = jnp.maximum(jnp.log(1.0 - y), -100.0)
    if target == 1.0:
        return -log_y
    if target == 0.0:
        return -log_1my
    t = jnp.float32(target)
    return -(t * log_y + (1.0 - t) * log_1my)


def _gan_loss_block_kernel(y_ref, out_ref, *, target, with_logits,
                           block_rows, acc_rows, num_blocks, n_valid):
    """One independent block: loss -> (8, 128) partial sum written to this block's slot."""
    i = pl.program_id(0)
    y = y_ref[...].astype(jnp.float32)
    loss = _bce_loss(y, target, with_logits)

    def _store(l):
        # Wide partial sums first (acc_rows//8 independent vreg add chains -> VALU ILP),
        # then collapse to a single (8, 128) tile-aligned, lane-dense output slab.
        a = l.reshape(block_rows // acc_rows, acc_rows, LANES).sum(axis=0)
        while a.shape[0] > 8:
            a = a.reshape(a.shape[0] // 8, 8, LANES).sum(axis=0)
        out_ref[...] = a.reshape(1, 8, LANES)

    def _tail_mask():
        # Only the last block can contain invalid elements (OOB edge rows and/or lane pad).
        valid_in_last = n_valid - (num_blocks - 1) * block_rows * LANES  # static Python int
        ridx = lax.broadcasted_iota(jnp.int32, (block_rows, LANES), 0)
        cidx = lax.broadcasted_iota(jnp.int32, (block_rows, LANES), 1)
        return (ridx * LANES + cidx) < valid_in_last

    needs_mask = num_blocks * block_rows * LANES > n_valid  # static
    if not needs_mask:
        _store(loss)
    elif num_blocks == 1:
        _store(jnp.where(_tail_mask(), loss, 0.0))
    else:
        last = num_blocks - 1

        @pl.when(i != last)
        def _():
            _store(loss)

        @pl.when(i == last)
        def _():
            _store(jnp.where(_tail_mask(), loss, 0.0))


def gan_loss(y, as_real=True, label_smoothing=False, use_sigmoid=True,
             max_block_rows=MAX_BLOCK_ROWS):
    """JAX/Pallas equivalent of GANLoss.forward(y, as_real)."""
    a = 0.9 if label_smoothing else 1.0
    target = float(a) if as_real else 0.0

    n = int(y.size)
    if n == 0:
        # TODO(synk): PyTorch's mean over an empty tensor is NaN; we return 0.0 instead.
        return jnp.float32(0.0)

    itemsize = int(jnp.dtype(y.dtype).itemsize)
    sub = max(8, 32 // max(1, itemsize))  # min sublane tile: 8 f32, 16 bf16, 32 int8/fp8
    flat = y.reshape(-1)                  # free for contiguous inputs; dtype preserved

    rows = -(-n // LANES)
    if n % LANES == 0 and rows >= sub:
        x2d = flat.reshape(rows, LANES)   # zero-copy lane-dense view (common case)
    else:
        # Lane-ragged (or tiny) input: one small pad up to a tile-compliant row count.
        # The padded elements are excluded by the in-kernel mask.
        rows = _round_up(rows, sub)
        x2d = jnp.pad(flat, (0, rows * LANES - n)).reshape(rows, LANES)

    cap = max(sub, (int(max_block_rows) // sub) * sub)
    block_rows = min(cap, (rows // sub) * sub)      # multiple of sub, never exceeds rows
    num_blocks = -(-rows // block_rows)
    acc_rows = 32 if block_rows % 32 == 0 else (16 if block_rows % 16 == 0 else 8)

    kernel = functools.partial(
        _gan_loss_block_kernel,
        target=target, with_logits=bool(use_sigmoid),
        block_rows=block_rows, acc_rows=acc_rows,
        num_blocks=num_blocks, n_valid=n)

    partials = pl.pallas_call(
        kernel,
        out_shape=jax.ShapeDtypeStruct((num_blocks, 8, LANES), jnp.float32),
        grid=(num_blocks,),
        in_specs=[pl.BlockSpec((block_rows, LANES), lambda i: (i, 0))],
        out_specs=pl.BlockSpec((1, 8, LANES), lambda i: (i, 0, 0)),
        compiler_params=pltpu.CompilerParams(
            dimension_semantics=("parallel",)),
        cost_estimate=pl.CostEstimate(
            flops=6 * n,
            transcendentals=2 * n,
            bytes_accessed=n * itemsize + num_blocks * 8 * LANES * 4),
    )(x2d)

    return jnp.sum(partials) / jnp.float32(n)


def gan_g_loss(y, label_smoothing=False, use_sigmoid=True):
    """JAX/Pallas equivalent of GANLoss.G_loss(y): target is always 1.0 (no smoothing)."""
    return gan_loss(y, as_real=True, label_smoothing=False, use_sigmoid=use_sigmoid)


def _reference_gan_loss(y, as_real=True, label_smoothing=False, use_sigmoid=True):
    a = 0.9 if label_smoothing else 1.0
    t = jnp.float32(a if as_real else 0.0)
    y = y.astype(jnp.float32)
    if use_sigmoid:
        loss = jnp.maximum(y, 0.0) - y * t + jnp.log1p(jnp.exp(-jnp.abs(y)))
    else:
        loss = -(t * jnp.maximum(jnp.log(y), -100.0)
                 + (1.0 - t) * jnp.maximum(jnp.log(1.0 - y), -100.0))
    return jnp.mean(loss)


if __name__ == "__main__":
    key = jax.random.PRNGKey(0)
    # Discriminator-style logits, NCHW (n = 2048 -> zero-copy lane-dense path, no mask).
    y = jax.random.normal(key, (2, 4, 16, 16), dtype=jnp.float32)

    loss_real = gan_loss(y, as_real=True)
    loss_fake = gan_loss(y, as_real=False)
    jax.block_until_ready((loss_real, loss_fake))
    assert jnp.allclose(loss_real, _reference_gan_loss(y, True), atol=1e-5, rtol=1e-5)
    assert jnp.allclose(loss_fake, _reference_gan_loss(y, False), atol=1e-5, rtol=1e-5)

    # Lane-ragged element count -> small pad + in-kernel tail mask (no analytic correction).
    y_odd = jax.random.normal(jax.random.PRNGKey(1), (3, 1, 7, 11), dtype=jnp.float32)
    loss_odd = gan_loss(y_odd, as_real=True)
    jax.block_until_ready(loss_odd)
    assert jnp.allclose(loss_odd, _reference_gan_loss(y_odd, True), atol=1e-5, rtol=1e-5)

    # Multi-block grid with a partially out-of-bounds last row-block (zero-copy path).
    y_mb = jax.random.normal(jax.random.PRNGKey(2), (2, 10, 128), dtype=jnp.float32)
    loss_mb = gan_loss(y_mb, as_real=False, max_block_rows=16)
    jax.block_until_ready(loss_mb)
    assert jnp.allclose(loss_mb, _reference_gan_loss(y_mb, False), atol=1e-5, rtol=1e-5)

    # bf16 input keeps its dtype through HBM (halved DMA bytes); f32 math in-kernel.
    y_bf16 = y.astype(jnp.bfloat16)
    loss_bf16 = gan_loss(y_bf16, as_real=True)
    jax.block_until_ready(loss_bf16)
    assert jnp.allclose(loss_bf16, _reference_gan_loss(y_bf16, True), atol=1e-5, rtol=1e-5)

    # Label smoothing path (target = 0.9) and generator-style call.
    loss_smooth = gan_loss(y, as_real=True, label_smoothing=True)
    loss_g = gan_g_loss(y)
    jax.block_until_ready((loss_smooth, loss_g))
    assert jnp.allclose(loss_smooth,
                        _reference_gan_loss(y, True, label_smoothing=True),
                        atol=1e-5, rtol=1e-5)
    assert jnp.allclose(loss_g, _reference_gan_loss(y, True), atol=1e-5, rtol=1e-5)

    print("KERNEL_OK")
</pallas_src>

<mosaic_0001>
module attributes {stable_mosaic.version = 11 : i64} {
  func.func @_gan_loss_block_kernel(%arg0: i32, %arg1: memref<16x128xf32, #tpu.memory_space<vmem>>, %arg2: memref<1x8x128xf32, #tpu.memory_space<vmem>>) attributes {dimension_semantics = [#tpu.dimension_semantics<parallel>], iteration_bounds = array<i64: 1>, scalar_prefetch = 0 : i64, scratch_operands = 0 : i64, tpu.core_type = #tpu.core_type<tc>, window_params = [{transform_indices = @transform_0, window_bounds = array<i64: 16, 128>}, {transform_indices = @transform_1, window_bounds = array<i64: 1, 8, 128>}]} {
    %c0 = arith.constant 0 : index
    %c0_0 = arith.constant 0 : index
    %0 = vector.load %arg1[%c0, %c0_0] : memref<16x128xf32, #tpu.memory_space<vmem>>, vector<16x128xf32>
    %1 = math.absf %0 : vector<16x128xf32>
    %cst = arith.constant 0.000000e+00 : f32
    %2 = vector.broadcast %cst : f32 to vector<16x128xf32>
    %3 = arith.subf %2, %1 : vector<16x128xf32>
    %4 = math.exp %3 : vector<16x128xf32>
    %5 = math.log1p %4 : vector<16x128xf32>
    %cst_1 = arith.constant 0.000000e+00 : f32
    %6 = vector.broadcast %cst_1 : f32 to vector<16x128xf32>
    %7 = arith.subf %6, %0 : vector<16x128xf32>
    %cst_2 = arith.constant 0.000000e+00 : f32
    %8 = vector.broadcast %cst_2 : f32 to vector<16x128xf32>
    %9 = arith.maximumf %7, %8 : vector<16x128xf32>
    %10 = arith.addf %9, %5 : vector<16x128xf32>
    %11 = vector.shape_cast %10 : vector<16x128xf32> to vector<1x16x128xf32>
    %cst_3 = arith.constant dense<0.000000e+00> : vector<16x128xf32>
    %12 = vector.multi_reduction <add>, %11, %cst_3 [0] : vector<1x16x128xf32> to vector<16x128xf32>
    %13 = vector.shape_cast %12 : vector<16x128xf32> to vector<2x8x128xf32>
    %cst_4 = arith.constant dense<0.000000e+00> : vector<8x128xf32>
    %14 = vector.multi_reduction <add>, %13, %cst_4 [0] : vector<2x8x128xf32> to vector<8x128xf32>
    %15 = vector.shape_cast %14 : vector<8x128xf32> to vector<1x8x128xf32>
    %c0_5 = arith.constant 0 : index
    %c0_6 = arith.constant 0 : index
    %c0_7 = arith.constant 0 : index
    %16 = vector.load %arg2[%c0_5, %c0_6, %c0_7] : memref<1x8x128xf32, #tpu.memory_space<vmem>>, vector<1x8x128xf32>
    tpu.vector_store %arg2[%c0_5, %c0_6, %c0_7], %15 {strides = array<i32>} : memref<1x8x128xf32, #tpu.memory_space<vmem>>, vector<1x8x128xf32>,
    return
  }
  func.func @transform_0(%arg0: i32) -> (i32, i32) {
    %c0_i32 = arith.constant 0 : i32
    %c0_i32_0 = arith.constant 0 : i32
    return %arg0, %c0_i32 : i32, i32
  }
  func.func @transform_1(%arg0: i32) -> (i32, i32, i32) {
    %c0_i32 = arith.constant 0 : i32
    %c0_i32_0 = arith.constant 0 : i32
    %c0_i32_1 = arith.constant 0 : i32
    return %arg0, %c0_i32, %c0_i32_0 : i32, i32, i32
  }
}

</mosaic_0001>

<bundles_post_ra>
// kernel: tpu_custom_call.1
= control target key start
LH: loop header
LB: loop body
LE: loop exit
PB: predicated region body
PF: predicated region fallthrough
CT: control target
= control target key end

     0   :  { %6 = vsyncpa [#allocation3], 0  ;;  %s174_s0 = inlined_call_operand.hbm [shape: f32[16,128], index: 0, kind: input, shape index: {}]   ;;  %s175_s1 = inlined_call_operand.hbm [shape: f32[1,8,128], index: 1, kind: output, shape index: {}]  }
   0x1   :  { %7 = vsyncpa [#allocation4], 0  ;;  %s136_s6 = smov [#allocation2]   ;;  %s88_s10 = scalar_lea.hbm %s174_s0, 256 }
   0x2   :  { %s13_s7 = sshll.u32 %s136_s6, 4  ;;  %p89_p0 = scmp.ne.s32.totalorder %s174_s0, %s88_s10  ;;  %s14_s7 = int_to_ptr.vmem [resolvable:$true] %s13_s7 }
   0x3   :  { %p92_p1 = scmp.lt.u32.totalorder %s88_s10, %s174_s0 }
   0x5   :  { %p94_p2 = pnand %p92_p1, %p89_p0 }
   0x7   :  { %97 = shalt.err (!%p94_p2)
}
   0x8   :  { %s98_s15 = scalar_lea.vmem %s14_s7, 256  ;;  %p103_p4 = scmp.lt.s32.totalorder %s14_s7, %s14_s7 }
   0x9   :  { %p99_p3 = scmp.ne.s32.totalorder %s14_s7, %s98_s15  ;;  %p104_p5 = scmp.lt.s32.totalorder %s98_s15, %s98_s15 }
   0xb   :  { %p105_p6 = por %p104_p5, %p103_p4 }
   0xd   :  { %p106_p7 = pnand %p105_p6, %p99_p3 }
   0xf   :  { %109 = shalt.err (!%p106_p7)
}
  0x10   :  { %s137_s16 = smov 128   ;;  %s138_s17 = smov 8  }
  0x11   :  { %19 = dma.hbm_to_vmem [thread:$0]  %s174_s0, 256, %s14_s7, [#allocation3], %s137_s16, %s137_s16, %s138_s17  }
  0x12   :  { %132 = dma.done.wait [#allocation3], 256  }
  0x13   :  { %133 = vsyncadd [#allocation3], 4294967040  ;;  %v23_v0 = vld [vmem:[#allocation2] sm:$0xff]  ;;  %v24_v1 = vld [vmem:[#allocation2 + $0x8] sm:$0xff]  ;;  %s139_s0 = smov [#allocation5]  }
  0x14   :  { %v25_v2 = vand.u32 2147483647, %v23_v0  ;;  %v26_v3 = vand.u32 2147483647, %v24_v1  ;;  %v51_v17 = vsub.f32 0.0, %v23_v0  ;;  %v52_v19 = vsub.f32 0.0, %v24_v1 }
  0x15   :  { %s67_s20 = sshll.u32 %s139_s0, 4  ;;  %s68_s20 = int_to_ptr.vmem [resolvable:$true] %s67_s20 }
  0x16   :  { %v27_v4 = vsub.f32 0.0, %v25_v2  ;;  %v28_v5 = vsub.f32 0.0, %v26_v3  ;;  %v53_v23 = vmax.f32 %v51_v17, 0.0  ;;  %v54_v26 = vmax.f32 %v52_v19, 0.0  ;;  %s110_s21 = scalar_lea.vmem %s68_s20, 128  ;;  %p115_p9 = scmp.lt.s32.totalorder %s68_s20, %s68_s20 }
  0x17   :  { %p111_p8 = scmp.ne.s32.totalorder %s68_s20, %s110_s21  ;;  %p116_p10 = scmp.lt.s32.totalorder %s110_s21, %s110_s21 }
  0x18   :  { %v29_v6 = vmul.f32 1.442695, %v27_v4  ;;  %v31_v7 = vmul.f32 1.442695, %v28_v5 }
  0x19   :  { %p117_p11 = por %p116_p10, %p115_p9 }
  0x1a   :  { %80 = vpow2.f32 %v29_v6 }
  0x1b   :  { %82 = vpow2.f32 %v31_v7  ;;  %p118_p12 = pnand %p117_p11, %p111_p8 }
  0x24   :  { %v81_v8 = vpop.eup %80 }
  0x25   :  { %v83_v9 = vpop.eup %82  ;;  %v33_v10 = vadd.f32 1.0, %v81_v8  ;;  %v36_v12 = vmul.f32 -0.5, %v81_v8  ;;  %v39_v15 = vand.u32 2147483647, %v81_v8 }
  0x26   :  { %v42_v11 = vadd.f32 1.0, %v83_v9  ;;  %v45_v13 = vmul.f32 -0.5, %v83_v9  ;;  %v48_v18 = vand.u32 2147483647, %v83_v9 }
  0x27   :  { %84 = vlog2.f32 %v33_v10  ;;  %v37_v14 = vadd.f32 1.0, %v36_v12  ;;  %vm40_vm0 = vcmp.lt.f32.partialorder %v39_v15, 0.0004427343 }
  0x28   :  { %86 = vlog2.f32 %v42_v11  ;;  %v46_v16 = vadd.f32 1.0, %v45_v13  ;;  %vm49_vm1 = vcmp.lt.f32.partialorder %v48_v18, 0.0004427343 }
  0x29   :  { %v38_v20 = vmul.f32 %v81_v8, %v37_v14 }
  0x2a   :  { %v47_v22 = vmul.f32 %v83_v9, %v46_v16 }
  0x31   :  { %v85_v21 = vpop.eup %84 }
  0x32   :  { %v87_v24 = vpop.eup %86  ;;  %v35_v25 = vmul.f32 0.6931472, %v85_v21 }
  0x33   :  { %v44_v27 = vmul.f32 0.6931472, %v87_v24 }
  0x34   :  { %v41_v28 = vsel %vm40_vm0, %v38_v20, %v35_v25 }
  0x35   :  { %v50_v29 = vsel %vm49_vm1, %v47_v22, %v44_v27  ;;  %v55_v30 = vadd.f32 %v53_v23, %v41_v28 }
  0x36   :  { %v56_v31 = vadd.f32 %v54_v26, %v50_v29 }
  0x38   :  { %v59_v32 = vadd.f32 %v56_v31, %v55_v30 }
  0x3a   :  { %60 = vst [vmem:[#allocation5] sm:$0xff] %v59_v32 }
  0x3b   :  { %121 = shalt.err (!%p118_p12)
}
  0x3c   :  { %s122_s24 = scalar_lea.hbm %s175_s1, 128 }
  0x3d   :  { %p123_p13 = scmp.ne.s32.totalorder %s175_s1, %s122_s24  ;;  %p126_p0 = scmp.lt.u32.totalorder %s122_s24, %s175_s1 }
  0x3f   :  { %p128_p1 = pnand %p126_p0, %p123_p13 }
  0x41   :  { %131 = shalt.err (!%p128_p1)
}
  0x42   :  { %70 = dma.vmem_to_hbm [thread:$0]  %s68_s20, 128, %s175_s1, [#allocation4]  }
  0x43   :  { %134 = dma.done.wait [#allocation4], 128  }
  0x44   :  { %135 = vsyncadd [#allocation4], 4294967168 }
  0x45   :  { %74 = vsyncpa [#allocation3], 1 }
  0x46   :  { %75 = vsyncpa [#allocation4], 1 }

</bundles_post_ra>
